<compile_context>
chip_gen: v6e
topology: v6e:2x2x1
jax: 0.10.0
libtpu: 0.0.40
codegen_flags: <defaults>
</compile_context>

<pallas_src>
import functools

import jax
import jax.numpy as jnp
from jax import lax
from jax.experimental import pallas as pl
from jax.experimental.pallas import tpu as pltpu


def _round_up(n, m):
    return ((n + m - 1) // m) * m


def _encoder_kernel(x2d_ref, h0_ref, c0_ref,
                    w_ih_ref, w_hh_ref, b_lstm_ref,
                    w1_ref, b1_ref, wz_ref, bz_ref,
                    emb_ref, hN_ref, cN_ref,
                    xproj_ref, h_all_ref):
    """Whole forward pass in one kernel invocation (no grid).

    Shapes (all VMEM-resident f32; Bp = batch padded to 8, Dp = input padded to 8,
    Hp / Op = hidden / output padded to 128):
      x2d_ref:    (S*Bp, Dp)
      h0/c0:      (Bp, Hp)
      w_ih_ref:   (Dp, 4*Hp)   (PyTorch weight_ih_l0.T, gate order i,f,g,o, per-gate padded)
      w_hh_ref:   (Hp, 4*Hp)   (PyTorch weight_hh_l0.T, per-gate padded)
      b_lstm_ref: (1, 4*Hp)    (bias_ih_l0 + bias_hh_l0, per-gate padded)
      w1_ref:     (Hp, Hp), b1_ref: (1, Hp)
      wz_ref:     (Hp, Op), bz_ref: (1, Op)
      emb_ref:    (S*Bp, Op)
      hN/cN:      (Bp, Hp)
      xproj_ref:  scratch (S*Bp, 4*Hp)   -- hoisted input projection
      h_all_ref:  scratch (S*Bp, Hp)     -- lane/sublane-dense hidden sequence
    """
    SB, _ = x2d_ref.shape
    Bp, Hp = h0_ref.shape
    S = SB // Bp

    # ---- Phase 1: hoisted input projection (one big MXU matmul, bias folded in).
    xproj_ref[...] = (
        jnp.dot(x2d_ref[...], w_ih_ref[...], preferred_element_type=jnp.float32)
        + b_lstm_ref[...])

    w_hh = w_hh_ref[...]   # hoisted load; stays resident across steps

    # ---- Phase 2: serial LSTM recurrence.  Only h @ W_hh + gate nonlinearities remain
    #      on the per-step critical path.  Gate slices are lane-aligned (Hp % 128 == 0).
    def step(t, carry):
        h, c = carry
        row = pl.multiple_of(t * Bp, Bp)
        gates = xproj_ref[pl.ds(row, Bp), :] + jnp.dot(
            h, w_hh, preferred_element_type=jnp.float32)           # (Bp, 4Hp)
        i_g = jax.nn.sigmoid(gates[:, 0 * Hp:1 * Hp])
        f_g = jax.nn.sigmoid(gates[:, 1 * Hp:2 * Hp])
        g_g = jnp.tanh(gates[:, 2 * Hp:3 * Hp])
        o_g = jax.nn.sigmoid(gates[:, 3 * Hp:4 * Hp])
        c_new = f_g * c + i_g * g_g
        h_new = o_g * jnp.tanh(c_new)
        h_all_ref[pl.ds(row, Bp), :] = h_new                        # single store / step
        return (h_new, c_new)

    h_fin, c_fin = lax.fori_loop(0, S, step, (h0_ref[...], c0_ref[...]),
                                 unroll=(S <= 16))
    hN_ref[...] = h_fin
    cN_ref[...] = c_fin

    # ---- Phase 3: fc1 -> ReLU -> m_z over the whole hidden sequence
    #      (two large, lane-dense MXU matmuls; output last dim is a 128 multiple).
    z1 = jnp.maximum(
        jnp.dot(h_all_ref[...], w1_ref[...], preferred_element_type=jnp.float32)
        + b1_ref[...], 0.0)
    emb_ref[...] = (
        jnp.dot(z1, wz_ref[...], preferred_element_type=jnp.float32)
        + bz_ref[...])


def init_encoder_params(key, input_dim, hidden_dim, output_dim):
    """Deterministic PyTorch-like init (uniform(-1/sqrt(H), 1/sqrt(H)))."""
    ks = jax.random.split(key, 10)
    k_lstm = 1.0 / jnp.sqrt(hidden_dim)

    def u(k, shape, bound):
        return jax.random.uniform(k, shape, jnp.float32, -bound, bound)

    return dict(
        weight_ih=u(ks[0], (4 * hidden_dim, input_dim), k_lstm),
        weight_hh=u(ks[1], (4 * hidden_dim, hidden_dim), k_lstm),
        bias_ih=u(ks[2], (4 * hidden_dim,), k_lstm),
        bias_hh=u(ks[3], (4 * hidden_dim,), k_lstm),
        fc1_w=u(ks[4], (hidden_dim, hidden_dim), 1.0 / jnp.sqrt(hidden_dim)),
        fc1_b=u(ks[5], (hidden_dim,), 1.0 / jnp.sqrt(hidden_dim)),
        mz_w=u(ks[6], (output_dim, hidden_dim), 1.0 / jnp.sqrt(hidden_dim)),
        mz_b=u(ks[7], (output_dim,), 1.0 / jnp.sqrt(hidden_dim)),
    )


def prepare_encoder_params(params):
    """Fuse / transpose / zero-pad the PyTorch-layout weights ONCE, outside jit.

    Hidden and output feature dims are padded to lane multiples of 128 (each of the four
    gate blocks i, f, g, o is padded independently so gate slices stay vreg-aligned);
    the LSTM input dim is padded to a sublane multiple of 8.  Zero padding is inert:
    padded gate columns produce gates == 0, and with zero-padded initial h/c the padded
    hidden/cell columns stay exactly 0 through the recurrence.
    """
    w_ih = jnp.asarray(params["weight_ih"], jnp.float32)   # (4H, Din)
    w_hh = jnp.asarray(params["weight_hh"], jnp.float32)   # (4H, H)
    b = jnp.asarray(params["bias_ih"] + params["bias_hh"], jnp.float32)  # (4H,)
    w1 = jnp.asarray(params["fc1_w"], jnp.float32)          # (H, H)
    b1 = jnp.asarray(params["fc1_b"], jnp.float32)          # (H,)
    wz = jnp.asarray(params["mz_w"], jnp.float32)           # (O, H)
    bz = jnp.asarray(params["mz_b"], jnp.float32)           # (O,)

    H = w_hh.shape[1]
    Din = w_ih.shape[1]
    O = wz.shape[0]
    Hp = _round_up(H, 128)
    Op = _round_up(O, 128)
    Dp = _round_up(Din, 8)

    def pad_gate_blocks(w, inner):   # (4H, inner) -> (4Hp, inner), per-gate zero pad
        return jnp.pad(w.reshape(4, H, inner),
                       ((0, 0), (0, Hp - H), (0, 0))).reshape(4 * Hp, inner)

    w_ih_p = jnp.pad(pad_gate_blocks(w_ih, Din), ((0, 0), (0, Dp - Din)))  # (4Hp, Dp)
    w_hh_p = jnp.pad(pad_gate_blocks(w_hh, H), ((0, 0), (0, Hp - H)))      # (4Hp, Hp)
    b_p = jnp.pad(b.reshape(4, H), ((0, 0), (0, Hp - H))).reshape(1, 4 * Hp)

    w1_p = jnp.pad(w1, ((0, Hp - H), (0, Hp - H)))                         # (Hp, Hp)
    b1_p = jnp.pad(b1, (0, Hp - H)).reshape(1, Hp)
    wz_p = jnp.pad(wz, ((0, Op - O), (0, Hp - H)))                         # (Op, Hp)
    bz_p = jnp.pad(bz, (0, Op - O)).reshape(1, Op)

    weights = dict(
        w_ih_t=jnp.asarray(w_ih_p.T),   # (Dp, 4Hp)
        w_hh_t=jnp.asarray(w_hh_p.T),   # (Hp, 4Hp)
        b_lstm=b_p,                     # (1, 4Hp)
        w1_t=jnp.asarray(w1_p.T),       # (Hp, Hp)
        b1=b1_p,                        # (1, Hp)
        wz_t=jnp.asarray(wz_p.T),       # (Hp, Op)
        bz=bz_p,                        # (1, Op)
    )
    dims = dict(H=H, O=O, Hp=Hp, Op=Op, Din=Din, Dp=Dp)
    return weights, dims


@functools.partial(jax.jit, static_argnames=("H", "O"))
def _encoder_jit(x, h0, c0, w_ih_t, w_hh_t, b_lstm, w1_t, b1, wz_t, bz, *, H, O):
    """x: (S, B, Din); h0/c0: (B, H).  Returns padded-sliced (emb, hN, cN)."""
    S, B, Din = x.shape
    Dp = w_ih_t.shape[0]
    Hp = w_hh_t.shape[0]
    Op = wz_t.shape[1]
    Bp = _round_up(B, 8)

    xp = jnp.pad(x.astype(jnp.float32), ((0, 0), (0, Bp - B), (0, Dp - Din)))
    x2d = xp.reshape(S * Bp, Dp)
    h0p = jnp.pad(h0.astype(jnp.float32), ((0, Bp - B), (0, Hp - H)))
    c0p = jnp.pad(c0.astype(jnp.float32), ((0, Bp - B), (0, Hp - H)))

    vmem = pl.BlockSpec(memory_space=pltpu.MemorySpace.VMEM)

    emb2d, hNp, cNp = pl.pallas_call(
        _encoder_kernel,
        out_shape=(
            jax.ShapeDtypeStruct((S * Bp, Op), jnp.float32),
            jax.ShapeDtypeStruct((Bp, Hp), jnp.float32),
            jax.ShapeDtypeStruct((Bp, Hp), jnp.float32),
        ),
        in_specs=[vmem] * 10,
        out_specs=(vmem, vmem, vmem),
        scratch_shapes=[
            pltpu.VMEM((S * Bp, 4 * Hp), jnp.float32),   # hoisted input projection
            pltpu.VMEM((S * Bp, Hp), jnp.float32),       # hidden-state sequence
        ],
        compiler_params=pltpu.CompilerParams(vmem_limit_bytes=32 * 1024 * 1024),
    )(x2d, h0p, c0p, w_ih_t, w_hh_t, b_lstm, w1_t, b1, wz_t, bz)

    emb = emb2d.reshape(S, Bp, Op)[:, :B, :O]
    hN = hNp[:B, :H][None]
    cN = cNp[:B, :H][None]
    return emb, hN, cN


def encoder_forward(x, hidden, weights, dims):
    """Mirrors Encoder.forward(x, hidden). Returns (embedding, (h_n, c_n))."""
    h0, c0 = hidden
    if x.ndim == 2:
        x = x[None]                                       # unsqueeze(0)
    S, B, _ = x.shape
    H, O = dims["H"], dims["O"]
    emb, hN, cN = _encoder_jit(
        x, h0.reshape(B, H), c0.reshape(B, H),
        weights["w_ih_t"], weights["w_hh_t"], weights["b_lstm"],
        weights["w1_t"], weights["b1"], weights["wz_t"], weights["bz"],
        H=H, O=O)
    embedding = emb[0] if S == 1 else emb                 # .squeeze(0)
    return embedding, (hN, cN)


def _reference_forward(x, h0, c0, params):
    """Pure-JAX reference replicating PyTorch LSTM + Linear semantics."""
    if x.ndim == 2:
        x = x[None]
    S, B, _ = x.shape
    H = params["weight_hh"].shape[1]
    w_ih, w_hh = params["weight_ih"], params["weight_hh"]
    b = params["bias_ih"] + params["bias_hh"]
    h, c = h0.reshape(B, H), c0.reshape(B, H)
    hs = []
    for t in range(S):
        g = x[t] @ w_ih.T + h @ w_hh.T + b
        i = jax.nn.sigmoid(g[:, 0 * H:1 * H])
        f = jax.nn.sigmoid(g[:, 1 * H:2 * H])
        gg = jnp.tanh(g[:, 2 * H:3 * H])
        o = jax.nn.sigmoid(g[:, 3 * H:4 * H])
        c = f * c + i * gg
        h = o * jnp.tanh(c)
        hs.append(h)
    hseq = jnp.stack(hs, 0)
    z1 = jax.nn.relu(hseq @ params["fc1_w"].T + params["fc1_b"])
    emb = z1 @ params["mz_w"].T + params["mz_b"]
    emb = emb[0] if S == 1 else emb
    return emb, (h[None], c[None])


if __name__ == "__main__":
    input_dim, hidden_dim, output_dim = 4, 32, 8
    batch, seq = 2, 8

    key = jax.random.PRNGKey(0)
    k_p, k_x, k_h, k_c, k_xs = jax.random.split(key, 5)
    params = init_encoder_params(k_p, input_dim, hidden_dim, output_dim)
    weights, dims = prepare_encoder_params(params)        # prepared once, reused

    h0 = jax.random.normal(k_h, (1, batch, hidden_dim), jnp.float32)
    c0 = jax.random.normal(k_c, (1, batch, hidden_dim), jnp.float32)

    # Path 1: 2-D observation -> unsqueezed to seq=1 (the module's primary path).
    x2 = jax.random.normal(k_x, (batch, input_dim), jnp.float32)
    emb, (hN, cN) = encoder_forward(x2, (h0, c0), weights, dims)
    jax.block_until_ready((emb, hN, cN))

    emb_r, (hN_r, cN_r) = _reference_forward(x2, h0, c0, params)
    assert emb.shape == (batch, output_dim)
    assert hN.shape == (1, batch, hidden_dim) and cN.shape == (1, batch, hidden_dim)
    assert jnp.allclose(emb, emb_r, atol=1e-4, rtol=1e-4)
    assert jnp.allclose(hN, hN_r, atol=1e-4, rtol=1e-4)
    assert jnp.allclose(cN, cN_r, atol=1e-4, rtol=1e-4)

    # Path 2: 3-D sequence input, exercising the recurrence loop (seq > 1).
    x3 = jax.random.normal(k_xs, (seq, batch, input_dim), jnp.float32)
    emb3, (hN3, cN3) = encoder_forward(x3, (h0, c0), weights, dims)
    jax.block_until_ready((emb3, hN3, cN3))

    emb3_r, (hN3_r, cN3_r) = _reference_forward(x3, h0, c0, params)
    assert emb3.shape == (seq, batch, output_dim)
    assert jnp.allclose(emb3, emb3_r, atol=1e-4, rtol=1e-4)
    assert jnp.allclose(hN3, hN3_r, atol=1e-4, rtol=1e-4)
    assert jnp.allclose(cN3, cN3_r, atol=1e-4, rtol=1e-4)

    print("KERNEL_OK")
</pallas_src>

<mosaic_0001>
module attributes {stable_mosaic.version = 11 : i64} {
  func.func @_encoder_kernel(%arg0: memref<8x8xf32, #tpu.memory_space<vmem>>, %arg1: memref<8x128xf32, #tpu.memory_space<vmem>>, %arg2: memref<8x128xf32, #tpu.memory_space<vmem>>, %arg3: memref<8x512xf32, #tpu.memory_space<vmem>>, %arg4: memref<128x512xf32, #tpu.memory_space<vmem>>, %arg5: memref<1x512xf32, #tpu.memory_space<vmem>>, %arg6: memref<128x128xf32, #tpu.memory_space<vmem>>, %arg7: memref<1x128xf32, #tpu.memory_space<vmem>>, %arg8: memref<128x128xf32, #tpu.memory_space<vmem>>, %arg9: memref<1x128xf32, #tpu.memory_space<vmem>>, %arg10: memref<8x128xf32, #tpu.memory_space<vmem>>, %arg11: memref<8x128xf32, #tpu.memory_space<vmem>>, %arg12: memref<8x128xf32, #tpu.memory_space<vmem>>, %arg13: memref<8x512xf32, #tpu.memory_space<vmem>>, %arg14: memref<8x128xf32, #tpu.memory_space<vmem>>) attributes {dimension_semantics = [], scalar_prefetch = 0 : i64, scratch_operands = 2 : i64, tpu.core_type = #tpu.core_type<tc>} {
    %c0 = arith.constant 0 : index
    %c0_0 = arith.constant 0 : index
    %0 = vector.load %arg0[%c0, %c0_0] : memref<8x8xf32, #tpu.memory_space<vmem>>, vector<8x8xf32>
    %c0_1 = arith.constant 0 : index
    %c0_2 = arith.constant 0 : index
    %1 = vector.load %arg3[%c0_1, %c0_2] : memref<8x512xf32, #tpu.memory_space<vmem>>, vector<8x512xf32>
    %cst = arith.constant dense<0.000000e+00> : vector<8x512xf32>
    %2 = tpu.matmul %0, %1, %cst {dimension_numbers = #tpu.dot_dimension_numbers<[1], [0], [0], [1], [0, 0, 1, 1], [], []>} : vector<8x8xf32>, vector<8x512xf32>, vector<8x512xf32> -> vector<8x512xf32>
    %c0_3 = arith.constant 0 : index
    %c0_4 = arith.constant 0 : index
    %3 = vector.load %arg5[%c0_3, %c0_4] : memref<1x512xf32, #tpu.memory_space<vmem>>, vector<1x512xf32>
    %4 = vector.broadcast %3 : vector<1x512xf32> to vector<8x512xf32>
    %5 = arith.addf %2, %4 : vector<8x512xf32>
    %c0_5 = arith.constant 0 : index
    %c0_6 = arith.constant 0 : index
    %6 = vector.load %arg13[%c0_5, %c0_6] : memref<8x512xf32, #tpu.memory_space<vmem>>, vector<8x512xf32>
    tpu.vector_store %arg13[%c0_5, %c0_6], %5 {strides = array<i32>} : memref<8x512xf32, #tpu.memory_space<vmem>>, vector<8x512xf32>,
    %c0_7 = arith.constant 0 : index
    %c0_8 = arith.constant 0 : index
    %7 = vector.load %arg4[%c0_7, %c0_8] : memref<128x512xf32, #tpu.memory_space<vmem>>, vector<128x512xf32>
    %c0_9 = arith.constant 0 : index
    %c0_10 = arith.constant 0 : index
    %8 = vector.load %arg1[%c0_9, %c0_10] : memref<8x128xf32, #tpu.memory_space<vmem>>, vector<8x128xf32>
    %c0_11 = arith.constant 0 : index
    %c0_12 = arith.constant 0 : index
    %9 = vector.load %arg2[%c0_11, %c0_12] : memref<8x128xf32, #tpu.memory_space<vmem>>, vector<8x128xf32>
    %c0_i32 = arith.constant 0 : i32
    %c8_i32 = arith.constant 8 : i32
    %10 = arith.muli %c0_i32, %c8_i32 : i32
    %11 = tpu.assume_multiple %10, 8 : i32
    %12 = arith.index_cast %11 : i32 to index
    %c0_13 = arith.constant 0 : index
    %13 = vector.load %arg13[%12, %c0_13] : memref<8x512xf32, #tpu.memory_space<vmem>>, vector<8x512xf32>
    %cst_14 = arith.constant dense<0.000000e+00> : vector<8x512xf32>
    %14 = tpu.matmul %8, %7, %cst_14 {dimension_numbers = #tpu.dot_dimension_numbers<[1], [0], [0], [1], [0, 0, 1, 1], [], []>} : vector<8x128xf32>, vector<128x512xf32>, vector<8x512xf32> -> vector<8x512xf32>
    %15 = arith.addf %13, %14 : vector<8x512xf32>
    %16 = vector.extract_strided_slice %15 {offsets = [0, 0], sizes = [8, 128], strides = [1, 1]} : vector<8x512xf32> to vector<8x128xf32>
    %17 = arith.negf %16 : vector<8x128xf32>
    %18 = math.exp %17 : vector<8x128xf32>
    %cst_15 = arith.constant 1.000000e+00 : f32
    %19 = vector.broadcast %cst_15 : f32 to vector<8x128xf32>
    %20 = arith.addf %19, %18 : vector<8x128xf32>
    %21 = arith.divf %19, %20 : vector<8x128xf32>
    %22 = vector.extract_strided_slice %15 {offsets = [0, 128], sizes = [8, 128], strides = [1, 1]} : vector<8x512xf32> to vector<8x128xf32>
    %23 = arith.negf %22 : vector<8x128xf32>
    %24 = math.exp %23 : vector<8x128xf32>
    %cst_16 = arith.constant 1.000000e+00 : f32
    %25 = vector.broadcast %cst_16 : f32 to vector<8x128xf32>
    %26 = arith.addf %25, %24 : vector<8x128xf32>
    %27 = arith.divf %25, %26 : vector<8x128xf32>
    %28 = vector.extract_strided_slice %15 {offsets = [0, 256], sizes = [8, 128], strides = [1, 1]} : vector<8x512xf32> to vector<8x128xf32>
    %29 = math.tanh %28 : vector<8x128xf32>
    %30 = vector.extract_strided_slice %15 {offsets = [0, 384], sizes = [8, 128], strides = [1, 1]} : vector<8x512xf32> to vector<8x128xf32>
    %31 = arith.negf %30 : vector<8x128xf32>
    %32 = math.exp %31 : vector<8x128xf32>
    %cst_17 = arith.constant 1.000000e+00 : f32
    %33 = vector.broadcast %cst_17 : f32 to vector<8x128xf32>
    %34 = arith.addf %33, %32 : vector<8x128xf32>
    %35 = arith.divf %33, %34 : vector<8x128xf32>
    %36 = arith.mulf %27, %9 : vector<8x128xf32>
    %37 = arith.mulf %21, %29 : vector<8x128xf32>
    %38 = arith.addf %36, %37 : vector<8x128xf32>
    %39 = math.tanh %38 : vector<8x128xf32>
    %40 = arith.mulf %35, %39 : vector<8x128xf32>
    %41 = arith.index_cast %11 : i32 to index
    %c0_18 = arith.constant 0 : index
    %42 = vector.load %arg14[%41, %c0_18] : memref<8x128xf32, #tpu.memory_space<vmem>>, vector<8x128xf32>
    tpu.vector_store %arg14[%41, %c0_18], %40 {strides = array<i32>} : memref<8x128xf32, #tpu.memory_space<vmem>>, vector<8x128xf32>,
    %c1_i32 = arith.constant 1 : i32
    %c0_19 = arith.constant 0 : index
    %c0_20 = arith.constant 0 : index
    %43 = vector.load %arg11[%c0_19, %c0_20] : memref<8x128xf32, #tpu.memory_space<vmem>>, vector<8x128xf32>
    tpu.vector_store %arg11[%c0_19, %c0_20], %40 {strides = array<i32>} : memref<8x128xf32, #tpu.memory_space<vmem>>, vector<8x128xf32>,
    %c0_21 = arith.constant 0 : index
    %c0_22 = arith.constant 0 : index
    %44 = vector.load %arg12[%c0_21, %c0_22] : memref<8x128xf32, #tpu.memory_space<vmem>>, vector<8x128xf32>
    tpu.vector_store %arg12[%c0_21, %c0_22], %38 {strides = array<i32>} : memref<8x128xf32, #tpu.memory_space<vmem>>, vector<8x128xf32>,
    %c0_23 = arith.constant 0 : index
    %c0_24 = arith.constant 0 : index
    %45 = vector.load %arg14[%c0_23, %c0_24] : memref<8x128xf32, #tpu.memory_space<vmem>>, vector<8x128xf32>
    %c0_25 = arith.constant 0 : index
    %c0_26 = arith.constant 0 : index
    %46 = vector.load %arg6[%c0_25, %c0_26] : memref<128x128xf32, #tpu.memory_space<vmem>>, vector<128x128xf32>
    %cst_27 = arith.constant dense<0.000000e+00> : vector<8x128xf32>
    %47 = tpu.matmul %45, %46, %cst_27 {dimension_numbers = #tpu.dot_dimension_numbers<[1], [0], [0], [1], [0, 0, 1, 1], [], []>} : vector<8x128xf32>, vector<128x128xf32>, vector<8x128xf32> -> vector<8x128xf32>
    %c0_28 = arith.constant 0 : index
    %c0_29 = arith.constant 0 : index
    %48 = vector.load %arg7[%c0_28, %c0_29] : memref<1x128xf32, #tpu.memory_space<vmem>>, vector<1x128xf32>
    %49 = vector.broadcast %48 : vector<1x128xf32> to vector<8x128xf32>
    %50 = arith.addf %47, %49 : vector<8x128xf32>
    %cst_30 = arith.constant 0.000000e+00 : f32
    %51 = vector.broadcast %cst_30 : f32 to vector<8x128xf32>
    %52 = arith.maximumf %50, %51 : vector<8x128xf32>
    %c0_31 = arith.constant 0 : index
    %c0_32 = arith.constant 0 : index
    %53 = vector.load %arg8[%c0_31, %c0_32] : memref<128x128xf32, #tpu.memory_space<vmem>>, vector<128x128xf32>
    %cst_33 = arith.constant dense<0.000000e+00> : vector<8x128xf32>
    %54 = tpu.matmul %52, %53, %cst_33 {dimension_numbers = #tpu.dot_dimension_numbers<[1], [0], [0], [1], [0, 0, 1, 1], [], []>} : vector<8x128xf32>, vector<128x128xf32>, vector<8x128xf32> -> vector<8x128xf32>
    %c0_34 = arith.constant 0 : index
    %c0_35 = arith.constant 0 : index
    %55 = vector.load %arg9[%c0_34, %c0_35] : memref<1x128xf32, #tpu.memory_space<vmem>>, vector<1x128xf32>
    %56 = vector.broadcast %55 : vector<1x128xf32> to vector<8x128xf32>
    %57 = arith.addf %54, %56 : vector<8x128xf32>
    %c0_36 = arith.constant 0 : index
    %c0_37 = arith.constant 0 : index
    %58 = vector.load %arg10[%c0_36, %c0_37] : memref<8x128xf32, #tpu.memory_space<vmem>>, vector<8x128xf32>
    tpu.vector_store %arg10[%c0_36, %c0_37], %57 {strides = array<i32>} : memref<8x128xf32, #tpu.memory_space<vmem>>, vector<8x128xf32>,
    return
  }
}

</mosaic_0001>

<bundles_post_ra>
// kernel: _encoder_jit.1
= control target key start
LH: loop header
LB: loop body
LE: loop exit
PB: predicated region body
PF: predicated region fallthrough
CT: control target
= control target key end

     0   :  { %18 = vsyncpa [#allocation5], 0  ;;  %s1067_s0 = inlined_call_operand.vmem [shape: f32[8,8], index: 0, kind: input, shape index: {}]   ;;  %s1068_s1 = inlined_call_operand.vmem [shape: f32[8,128], index: 1, kind: input, shape index: {}]   ;;  %s1069_s2 = inlined_call_operand.vmem [shape: f32[8,128], index: 2, kind: input, shape index: {}]   ;;  %s1070_s3 = inlined_call_operand.vmem [shape: f32[8,512], index: 3, kind: input, shape index: {}]   ;;  %s1071_s4 = inlined_call_operand.hbm [shape: f32[128,512], index: 4, kind: input, shape index: {}]   ;;  %s1072_s5 = inlined_call_operand.vmem [shape: f32[1,512], index: 5, kind: input, shape index: {}]   ;;  %s1073_s6 = inlined_call_operand.hbm [shape: f32[128,128], index: 6, kind: input, shape index: {}]   ;;  %s1074_s7 = inlined_call_operand.vmem [shape: f32[1,128], index: 7, kind: input, shape index: {}]   ;;  %s1075_s8 = inlined_call_operand.hbm [shape: f32[128,128], index: 8, kind: input, shape index: {}]   ;;  %s1076_s9 = inlined_call_operand.vmem [shape: f32[1,128], index: 9, kind: input, shape index: {}]   ;;  %s1077_s10 = inlined_call_operand.vmem [shape: f32[8,128], index: 10, kind: output, shape index: {0}]   ;;  %s1078_s11 = inlined_call_operand.vmem [shape: f32[8,128], index: 11, kind: output, shape index: {1}]   ;;  %s1079_s12 = inlined_call_operand.vmem [shape: f32[8,128], index: 12, kind: output, shape index: {2}]  }
   0x1   :  { %19 = vsyncpa [#allocation7], 0  ;;  %s905_s21 = smov [#allocation6]  }
   0x2   :  { %s47_s22 = sshll.u32 %s905_s21, 4  ;;  %s48_s22 = int_to_ptr.vmem [resolvable:$true] %s47_s22 }
   0x3   :  { %s849_s23 = scalar_lea.vmem %s48_s22, 2048  ;;  %p854_p1 = scmp.lt.s32.totalorder %s48_s22, %s48_s22 }
   0x4   :  { %p850_p0 = scmp.ne.s32.totalorder %s48_s22, %s849_s23  ;;  %p855_p2 = scmp.lt.s32.totalorder %s849_s23, %s849_s23 }
   0x6   :  { %p856_p3 = por %p855_p2, %p854_p1 }
   0x8   :  { %p857_p4 = pnand %p856_p3, %p850_p0 }
   0xa   :  { %860 = shalt.err (!%p857_p4)
}
   0xb   :  { %s906_s24 = smov 128   ;;  %s907_s25 = smov 8  }
   0xc   :  { %53 = dma.hbm_to_vmem [thread:$0]  %s1073_s6, 2048, %s48_s22, [#allocation7], %s906_s24, %s906_s24, %s907_s25  }
   0xd   :  { %s908_s28 = smov [#allocation4]  }
   0xe   :  { %s33_s29 = sshll.u32 %s908_s28, 4  ;;  %s34_s29 = int_to_ptr.vmem [resolvable:$true] %s33_s29 }
   0xf   :  { %s869_s30 = scalar_lea.vmem %s34_s29, 8192  ;;  %p874_p6 = scmp.lt.s32.totalorder %s34_s29, %s34_s29 }
  0x10   :  { %p870_p5 = scmp.ne.s32.totalorder %s34_s29, %s869_s30  ;;  %p875_p7 = scmp.lt.s32.totalorder %s869_s30, %s869_s30 }
  0x12   :  { %p876_p8 = por %p875_p7, %p874_p6 }
  0x14   :  { %p877_p9 = pnand %p876_p8, %p870_p5 }
  0x16   :  { %880 = shalt.err (!%p877_p9)
}
  0x17   :  { %s909_s13 = smov 512   ;;  %s910_s14 = smov 32  }
  0x18   :  { %39 = dma.hbm_to_vmem [thread:$0]  %s1071_s4, 8192, %s34_s29, [#allocation5], %s909_s13, %s909_s13, %s910_s14  }
  0x19   :  { %s911_s17 = smov [#allocation8]  }
  0x1a   :  { %s61_s18 = sshll.u32 %s911_s17, 4  ;;  %s62_s18 = int_to_ptr.vmem [resolvable:$true] %s61_s18 }
  0x1b   :  { %s889_s6 = scalar_lea.vmem %s62_s18, 2048  ;;  %p894_p11 = scmp.lt.s32.totalorder %s62_s18, %s62_s18 }
  0x1c   :  { %p890_p10 = scmp.ne.s32.totalorder %s62_s18, %s889_s6  ;;  %p895_p12 = scmp.lt.s32.totalorder %s889_s6, %s889_s6 }
  0x1e   :  { %p896_p13 = por %p895_p12, %p894_p11 }
  0x20   :  { %p897_p0 = pnand %p896_p13, %p890_p10 }
  0x22   :  { %900 = shalt.err (!%p897_p0)
}
  0x23   :  { %67 = dma.hbm_to_vmem [thread:$0]  %s1075_s8, 2048, %s62_s18, [#allocation7], %s906_s24, %s906_s24, %s907_s25  }
  0x24   :  { %901 = dma.done.wait [#allocation5], 8192  }
  0x25   :  { %902 = vsyncadd [#allocation5], 4294959104 }
  0x26   :  { %903 = dma.done.wait [#allocation7], 4096  }
  0x27   :  { %904 = vsyncadd [#allocation7], 4294963200  ;;  %v912_v0 = vmov 0.0   ;;  %v81_v1 = vld [vmem:[%s1070_s3 + $0x8] sm:$0xff]  ;;  %v83_v2 = vld [vmem:[%s1070_s3 + $0x18] sm:$0xff]  ;;  %vm106_vm0 = vcmask 64512  }
  0x28   :  { %174 = vmatprep.mubr.f32.mxu0 %v912_v0  ;;  %245 = vmatprep.mubr.f32.mxu1 %v912_v0  ;;  %v80_v3 = vld [vmem:[%s1070_s3] sm:$0xff]  ;;  %v82_v4 = vld [vmem:[%s1070_s3 + $0x10] sm:$0xff]  ;;  %v317_v6 = vld [vmem:[#allocation4 + $0x1e8] sm:$0xff]  ;;  %vm913_vm1 = vmmov 0  }
  0x29   :  { %140 = vmatprep.subr.mxu0 %v81_v1  ;;  %211 = vmatprep.subr.mxu1 %v83_v2  ;;  %v79_v5 = vld [vmem:[%s1067_s0] sm:$0xff]  ;;  %v319_v7 = vld [vmem:[#allocation4 + $0x1f8] sm:$0xff]  ;;  %v318_v9 = vld [vmem:[#allocation4 + $0x1f0] sm:$0xff] }
  0x2a   :  { %141 = vmatpush1.msra.mxu0 %v80_v3  ;;  %212 = vmatpush1.msra.mxu1 %v82_v4  ;;  %v316_v8 = vld [vmem:[#allocation4 + $0x1e0] sm:$0xff]  ;;  %v313_v10 = vld [vmem:[#allocation4 + $0x1c8] sm:$0xff]  ;;  %v315_v11 = vld [vmem:[#allocation4 + $0x1d8] sm:$0xff] }
  0x2b   :  { %705 = vmatmul.mubr.msk.f32.vlgmr.msra.gmra.mxu0 %vm106_vm0, %v79_v5  ;;  %329 = vmatprep.subr.mxu0 %v317_v6  ;;  %v312_v12 = vld [vmem:[#allocation4 + $0x1c0] sm:$0xff]  ;;  %v314_v13 = vld [vmem:[#allocation4 + $0x1d0] sm:$0xff]  ;;  %v309_v14 = vld [vmem:[#allocation4 + $0x1a8] sm:$0xff] }
  0x2c   :  { %400 = vmatprep.subr.mxu1 %v319_v7  ;;  %706 = vmatmul.mubr.msk.f32.vlgmr.msra.gmra.mxu1 %vm106_vm0, %v79_v5  ;;  %v311_v15 = vld [vmem:[#allocation4 + $0x1b8] sm:$0xff]  ;;  %v308_v16 = vld [vmem:[#allocation4 + $0x1a0] sm:$0xff]  ;;  %v310_v17 = vld [vmem:[#allocation4 + $0x1b0] sm:$0xff] }
  0x2d   :  { %330 = vmatpush1.msra.mxu0 %v316_v8  ;;  %401 = vmatpush1.msra.mxu1 %v318_v9  ;;  %v305_v18 = vld [vmem:[#allocation4 + $0x188] sm:$0xff]  ;;  %v307_v19 = vld [vmem:[#allocation4 + $0x198] sm:$0xff]  ;;  %v304_v20 = vld [vmem:[#allocation4 + $0x180] sm:$0xff] }
  0x2e   :  { %331 = vmatprep.subr.mxu0 %v313_v10  ;;  %402 = vmatprep.subr.mxu1 %v315_v11  ;;  %v306_v21 = vld [vmem:[#allocation4 + $0x190] sm:$0xff]  ;;  %v301_v22 = vld [vmem:[#allocation4 + $0x168] sm:$0xff]  ;;  %v303_v23 = vld [vmem:[#allocation4 + $0x178] sm:$0xff] }
  0x2f   :  { %332 = vmatpush1.msra.mxu0 %v312_v12  ;;  %403 = vmatpush1.msra.mxu1 %v314_v13  ;;  %v300_v24 = vld [vmem:[#allocation4 + $0x160] sm:$0xff]  ;;  %v302_v25 = vld [vmem:[#allocation4 + $0x170] sm:$0xff]  ;;  %v297_v26 = vld [vmem:[#allocation4 + $0x148] sm:$0xff] }
  0x30   :  { %333 = vmatprep.subr.mxu0 %v309_v14  ;;  %404 = vmatprep.subr.mxu1 %v311_v15  ;;  %v299_v27 = vld [vmem:[#allocation4 + $0x158] sm:$0xff]  ;;  %v296_v28 = vld [vmem:[#allocation4 + $0x140] sm:$0xff]  ;;  %v298_v29 = vld [vmem:[#allocation4 + $0x150] sm:$0xff] }
  0x31   :  { %334 = vmatpush1.msra.mxu0 %v308_v16  ;;  %405 = vmatpush1.msra.mxu1 %v310_v17  ;;  %v293_v30 = vld [vmem:[#allocation4 + $0x128] sm:$0xff]  ;;  %v295_v31 = vld [vmem:[#allocation4 + $0x138] sm:$0xff]  ;;  %v292_v32 = vld [vmem:[#allocation4 + $0x120] sm:$0xff] }
  0x32   :  { %335 = vmatprep.subr.mxu0 %v305_v18  ;;  %406 = vmatprep.subr.mxu1 %v307_v19  ;;  %v294_v33 = vld [vmem:[#allocation4 + $0x130] sm:$0xff]  ;;  %v289_v34 = vld [vmem:[#allocation4 + $0x108] sm:$0xff]  ;;  %v291_v35 = vld [vmem:[#allocation4 + $0x118] sm:$0xff] }
  0x33   :  { %336 = vmatpush1.msra.mxu0 %v304_v20  ;;  %407 = vmatpush1.msra.mxu1 %v306_v21  ;;  %v288_v36 = vld [vmem:[#allocation4 + $0x100] sm:$0xff]  ;;  %v290_v37 = vld [vmem:[#allocation4 + $0x110] sm:$0xff]  ;;  %v285_v38 = vld [vmem:[#allocation4 + $0xe8] sm:$0xff] }
  0x34   :  { %337 = vmatprep.subr.mxu0 %v301_v22  ;;  %408 = vmatprep.subr.mxu1 %v303_v23  ;;  %v287_v39 = vld [vmem:[#allocation4 + $0xf8] sm:$0xff]  ;;  %v284_v40 = vld [vmem:[#allocation4 + $0xe0] sm:$0xff]  ;;  %v286_v41 = vld [vmem:[#allocation4 + $0xf0] sm:$0xff] }
  0x35   :  { %338 = vmatpush1.msra.mxu0 %v300_v24  ;;  %409 = vmatpush1.msra.mxu1 %v302_v25  ;;  %v281_v42 = vld [vmem:[#allocation4 + $0xc8] sm:$0xff]  ;;  %v283_v43 = vld [vmem:[#allocation4 + $0xd8] sm:$0xff]  ;;  %v280_v44 = vld [vmem:[#allocation4 + $0xc0] sm:$0xff] }
  0x36   :  { %339 = vmatprep.subr.mxu0 %v297_v26  ;;  %410 = vmatprep.subr.mxu1 %v299_v27  ;;  %v282_v45 = vld [vmem:[#allocation4 + $0xd0] sm:$0xff]  ;;  %v277_v46 = vld [vmem:[#allocation4 + $0xa8] sm:$0xff]  ;;  %v279_v47 = vld [vmem:[#allocation4 + $0xb8] sm:$0xff] }
  0x37   :  { %340 = vmatpush1.msra.mxu0 %v296_v28  ;;  %411 = vmatpush1.msra.mxu1 %v298_v29  ;;  %v276_v48 = vld [vmem:[#allocation4 + $0xa0] sm:$0xff]  ;;  %v278_v49 = vld [vmem:[#allocation4 + $0xb0] sm:$0xff]  ;;  %v273_v50 = vld [vmem:[#allocation4 + $0x88] sm:$0xff] }
  0x38   :  { %341 = vmatprep.subr.mxu0 %v293_v30  ;;  %412 = vmatprep.subr.mxu1 %v295_v31  ;;  %v275_v51 = vld [vmem:[#allocation4 + $0x98] sm:$0xff]  ;;  %v272_v52 = vld [vmem:[#allocation4 + $0x80] sm:$0xff]  ;;  %v274_v53 = vld [vmem:[#allocation4 + $0x90] sm:$0xff] }
  0x39   :  { %342 = vmatpush1.msra.mxu0 %v292_v32  ;;  %413 = vmatpush1.msra.mxu1 %v294_v33  ;;  %v269_v54 = vld [vmem:[#allocation4 + $0x68] sm:$0xff]  ;;  %v271_v55 = vld [vmem:[#allocation4 + $0x78] sm:$0xff]  ;;  %v268_v56 = vld [vmem:[#allocation4 + $0x60] sm:$0xff] }
  0x3a   :  { %343 = vmatprep.subr.mxu0 %v289_v34  ;;  %414 = vmatprep.subr.mxu1 %v291_v35  ;;  %v270_v57 = vld [vmem:[#allocation4 + $0x70] sm:$0xff]  ;;  %v265_v58 = vld [vmem:[#allocation4 + $0x48] sm:$0xff]  ;;  %v267_v59 = vld [vmem:[#allocation4 + $0x58] sm:$0xff] }
  0x3b   :  { %344 = vmatpush1.msra.mxu0 %v288_v36  ;;  %415 = vmatpush1.msra.mxu1 %v290_v37  ;;  %v264_v60 = vld [vmem:[#allocation4 + $0x40] sm:$0xff]  ;;  %v266_v61 = vld [vmem:[#allocation4 + $0x50] sm:$0xff]  ;;  %v261_v62 = vld [vmem:[#allocation4 + $0x28] sm:$0xff]  ;;  %v86_v37 = vlaneseq }
  0x3c   :  { %345 = vmatprep.subr.mxu0 %v285_v38  ;;  %416 = vmatprep.subr.mxu1 %v287_v39  ;;  %v263_v63 = vld [vmem:[#allocation4 + $0x38] sm:$0xff]  ;;  %v260_v1 = vld [vmem:[#allocation4 + $0x20] sm:$0xff]  ;;  %v262_v2 = vld [vmem:[#allocation4 + $0x30] sm:$0xff] }
  0x3d   :  { %346 = vmatpush1.msra.mxu0 %v284_v40  ;;  %417 = vmatpush1.msra.mxu1 %v286_v41  ;;  %v257_v3 = vld [vmem:[#allocation4 + $0x8] sm:$0xff]  ;;  %v259_v4 = vld [vmem:[#allocation4 + $0x18] sm:$0xff]  ;;  %v256_v5 = vld [vmem:[#allocation4] sm:$0xff]  ;;  %v87_v38 = vshrl.u32 %v86_v37, 7 }
  0x3e   :  { %347 = vmatprep.subr.mxu0 %v281_v42  ;;  %418 = vmatprep.subr.mxu1 %v283_v43  ;;  %v258_v6 = vld [vmem:[#allocation4 + $0x10] sm:$0xff]  ;;  %v320_v7 = vld [vmem:[%s1068_s1] sm:$0xff]  ;;  %v518_v8 = vld [vmem:[#allocation6 + $0x78] sm:$0xff] }
  0x3f   :  { %348 = vmatpush1.msra.mxu0 %v280_v44  ;;  %419 = vmatpush1.msra.mxu1 %v282_v45  ;;  %v517_v9 = vld [vmem:[#allocation6 + $0x70] sm:$0xff]  ;;  %v516_v10 = vld [vmem:[#allocation6 + $0x68] sm:$0xff]  ;;  %v515_v11 = vld [vmem:[#allocation6 + $0x60] sm:$0xff]  ;;  %v88_v39 = vsub.s32 0, %v87_v38  ;;  %v92_v41 = vsub.s32 1, %v87_v38 }
  0x40   :  { %349 = vmatprep.subr.mxu0 %v277_v46  ;;  %420 = vmatprep.subr.mxu1 %v279_v47  ;;  %v514_v12 = vld [vmem:[#allocation6 + $0x58] sm:$0xff]  ;;  %v513_v13 = vld [vmem:[#allocation6 + $0x50] sm:$0xff]  ;;  %v512_v14 = vld [vmem:[#allocation6 + $0x48] sm:$0xff] }
  0x41   :  { %350 = vmatpush1.msra.mxu0 %v276_v48  ;;  %421 = vmatpush1.msra.mxu1 %v278_v49  ;;  %v511_v15 = vld [vmem:[#allocation6 + $0x40] sm:$0xff]  ;;  %v510_v16 = vld [vmem:[#allocation6 + $0x38] sm:$0xff]  ;;  %v509_v17 = vld [vmem:[#allocation6 + $0x30] sm:$0xff] }
  0x42   :  { %351 = vmatprep.subr.mxu0 %v273_v50  ;;  %422 = vmatprep.subr.mxu1 %v275_v51  ;;  %v508_v18 = vld [vmem:[#allocation6 + $0x28] sm:$0xff]  ;;  %v507_v19 = vld [vmem:[#allocation6 + $0x20] sm:$0xff]  ;;  %v506_v20 = vld [vmem:[#allocation6 + $0x18] sm:$0xff]  ;;  %v100_v51 = vsub.s32 3, %v87_v38 }
  0x43   :  { %352 = vmatpush1.msra.mxu0 %v272_v52  ;;  %423 = vmatpush1.msra.mxu1 %v274_v53  ;;  %v505_v21 = vld [vmem:[#allocation6 + $0x10] sm:$0xff]  ;;  %v504_v22 = vld [vmem:[#allocation6 + $0x8] sm:$0xff]  ;;  %v503_v23 = vld [vmem:[#allocation6] sm:$0xff] }
  0x44   :  { %353 = vmatprep.subr.mxu0 %v269_v54  ;;  %424 = vmatprep.subr.mxu1 %v271_v55  ;;  %v612_v24 = vld [vmem:[#allocation8 + $0x78] sm:$0xff]  ;;  %v611_v25 = vld [vmem:[#allocation8 + $0x70] sm:$0xff]  ;;  %v610_v26 = vld [vmem:[#allocation8 + $0x68] sm:$0xff] }
  0x45   :  { %354 = vmatpush1.msra.mxu0 %v268_v56  ;;  %425 = vmatpush1.msra.mxu1 %v270_v57  ;;  %v609_v27 = vld [vmem:[#allocation8 + $0x60] sm:$0xff]  ;;  %v608_v28 = vld [vmem:[#allocation8 + $0x58] sm:$0xff]  ;;  %v607_v29 = vld [vmem:[#allocation8 + $0x50] sm:$0xff] }
  0x46   :  { %355 = vmatprep.subr.mxu0 %v265_v58  ;;  %426 = vmatprep.subr.mxu1 %v267_v59  ;;  %v606_v30 = vld [vmem:[#allocation8 + $0x48] sm:$0xff]  ;;  %v605_v31 = vld [vmem:[#allocation8 + $0x40] sm:$0xff]  ;;  %v604_v32 = vld [vmem:[#allocation8 + $0x38] sm:$0xff]  ;;  %v96_v59 = vsub.s32 2, %v87_v38 }
  0x47   :  { %356 = vmatpush1.msra.mxu0 %v264_v60  ;;  %427 = vmatpush1.msra.mxu1 %v266_v61  ;;  %v603_v33 = vld [vmem:[#allocation8 + $0x30] sm:$0xff]  ;;  %v602_v34 = vld [vmem:[#allocation8 + $0x28] sm:$0xff]  ;;  %v601_v35 = vld [vmem:[#allocation8 + $0x20] sm:$0xff] }
  0x48   :  { %357 = vmatprep.subr.mxu0 %v261_v62  ;;  %428 = vmatprep.subr.mxu1 %v263_v63  ;;  %v600_v36 = vld [vmem:[#allocation8 + $0x18] sm:$0xff]  ;;  %v84_v40 = vld [vmem:[%s1072_s5] sm:$0xf] }
  0x49   :  { %358 = vmatpush1.msra.mxu0 %v260_v1  ;;  %429 = vmatpush1.msra.mxu1 %v262_v2  ;;  %v89_v43 = vrot.slane %v84_v40, %v88_v39  ;;  %v93_v44 = vrot.slane %v84_v40, %v92_v41  ;;  %v101_v58 = vrot.slane %v84_v40, %v100_v51 }
  0x4a   :  { %359 = vmatprep.subr.mxu0 %v257_v3  ;;  %430 = vmatprep.subr.mxu1 %v259_v4  ;;  %v97_v62 = vrot.slane %v84_v40, %v96_v59 }
  0x4b   :  { %360 = vmatpush1.msra.mxu0 %v256_v5  ;;  %393 = vmatprep.mubr.f32.mxu0 %v912_v0 }
  0x4c   :  { %431 = vmatpush1.msra.mxu1 %v258_v6  ;;  %464 = vmatprep.mubr.f32.mxu1 %v912_v0 }
  0x4d   :  { %394 = vmatmul.mubr.f32.vlgmr.msra.gmra.mxu0 %v320_v7  ;;  %465 = vmatmul.mubr.f32.vlgmr.msra.gmra.mxu1 %v320_v7 }
  0x4e   :  { %746 = vmatprep.subr.mxu0 %v912_v0  ;;  %781 = vmatprep.subr.mxu1 %v912_v0 }
  0x4f   :  { %747 = vmatpush3.msra.mxu0 %v518_v8  ;;  %778 = vmatprep.mubr.msk.f32.mxu0 %vm913_vm1, %v912_v0 }
  0x50   :  { %748 = vmatprep.subr.mxu0 %v912_v0  ;;  %813 = vmatprep.mubr.msk.f32.mxu1 %vm913_vm1, %v912_v0 }
  0x51   :  { %749 = vmatpush3.msra.mxu0 %v517_v9  ;;  %782 = vmatpush3.msra.mxu1 %v612_v24 }
  0x52   :  { %750 = vmatprep.subr.mxu0 %v912_v0  ;;  %783 = vmatprep.subr.mxu1 %v912_v0 }
  0x53   :  { %751 = vmatpush3.msra.mxu0 %v516_v10  ;;  %784 = vmatpush3.msra.mxu1 %v611_v25  ;;  %v321_v10 = vld [vmem:[%s1069_s2] sm:$0xff] }
  0x54   :  { %752 = vmatprep.subr.mxu0 %v912_v0  ;;  %785 = vmatprep.subr.mxu1 %v912_v0 }
  0x55   :  { %753 = vmatpush3.msra.mxu0 %v515_v11  ;;  %786 = vmatpush3.msra.mxu1 %v610_v26 }
  0x56   :  { %754 = vmatprep.subr.mxu0 %v912_v0  ;;  %787 = vmatprep.subr.mxu1 %v912_v0 }
  0x57   :  { %755 = vmatpush3.msra.mxu0 %v514_v12  ;;  %788 = vmatpush3.msra.mxu1 %v609_v27 }
  0x58   :  { %756 = vmatprep.subr.mxu0 %v912_v0  ;;  %789 = vmatprep.subr.mxu1 %v912_v0 }
  0x59   :  { %757 = vmatpush3.msra.mxu0 %v513_v13  ;;  %790 = vmatpush3.msra.mxu1 %v608_v28  ;;  %v711_v28 = vld [vmem:[%s1076_s9] ss:$0 sm:$0xff] }
  0x5a   :  { %758 = vmatprep.subr.mxu0 %v912_v0  ;;  %791 = vmatprep.subr.mxu1 %v912_v0 }
  0x5b   :  { %759 = vmatpush3.msra.mxu0 %v512_v14  ;;  %792 = vmatpush3.msra.mxu1 %v607_v29 }
  0x5c   :  { %760 = vmatprep.subr.mxu0 %v912_v0  ;;  %793 = vmatprep.subr.mxu1 %v912_v0 }
  0x5d   :  { %761 = vmatpush3.msra.mxu0 %v511_v15  ;;  %794 = vmatpush3.msra.mxu1 %v606_v30 }
  0x5e   :  { %762 = vmatprep.subr.mxu0 %v912_v0  ;;  %795 = vmatprep.subr.mxu1 %v912_v0 }
  0x5f   :  { %763 = vmatpush3.msra.mxu0 %v510_v16  ;;  %796 = vmatpush3.msra.mxu1 %v605_v31 }
  0x60   :  { %764 = vmatprep.subr.mxu0 %v912_v0  ;;  %797 = vmatprep.subr.mxu1 %v912_v0 }
  0x61   :  { %765 = vmatpush3.msra.mxu0 %v509_v17  ;;  %798 = vmatpush3.msra.mxu1 %v604_v32 }
  0x62   :  { %766 = vmatprep.subr.mxu0 %v912_v0  ;;  %799 = vmatprep.subr.mxu1 %v912_v0 }
  0x63   :  { %767 = vmatpush3.msra.mxu0 %v508_v18  ;;  %800 = vmatpush3.msra.mxu1 %v603_v33 }
  0x64   :  { %768 = vmatprep.subr.mxu0 %v912_v0  ;;  %801 = vmatprep.subr.mxu1 %v912_v0 }
  0x65   :  { %769 = vmatpush3.msra.mxu0 %v507_v19  ;;  %802 = vmatpush3.msra.mxu1 %v602_v34 }
  0x66   :  { %770 = vmatprep.subr.mxu0 %v912_v0  ;;  %803 = vmatprep.subr.mxu1 %v912_v0 }
  0x67   :  { %771 = vmatpush3.msra.mxu0 %v506_v20  ;;  %804 = vmatpush3.msra.mxu1 %v601_v35  ;;  %v599_v20 = vld [vmem:[#allocation8 + $0x10] sm:$0xff] }
  0x68   :  { %772 = vmatprep.subr.mxu0 %v912_v0  ;;  %805 = vmatprep.subr.mxu1 %v912_v0 }
  0x69   :  { %773 = vmatpush3.msra.mxu0 %v505_v21  ;;  %806 = vmatpush3.msra.mxu1 %v600_v36  ;;  %v598_v21 = vld [vmem:[#allocation8 + $0x8] sm:$0xff] }
  0x6a   :  { %774 = vmatprep.subr.mxu0 %v912_v0  ;;  %807 = vmatprep.subr.mxu1 %v912_v0 }
  0x6b   :  { %775 = vmatpush3.msra.mxu0 %v504_v22  ;;  %808 = vmatpush3.msra.mxu1 %v599_v20  ;;  %v597_v22 = vld [vmem:[#allocation8] sm:$0xff] }
  0x6c   :  { %776 = vmatprep.subr.mxu0 %v912_v0  ;;  %809 = vmatprep.subr.mxu1 %v912_v0 }
  0x6d   :  { %777 = vmatpush3.msra.mxu0 %v503_v23  ;;  %810 = vmatpush3.msra.mxu1 %v598_v21  ;;  %v710_v23 = vld [vmem:[%s1074_s7] ss:$0 sm:$0xff] }
  0x6e   :  { %811 = vmatprep.subr.mxu1 %v912_v0 }
  0x6f   :  { %812 = vmatpush3.msra.mxu1 %v597_v22 }
  0xeb   :  { %v176_v42 = vpop.f32.mrf.mxu0 }
  0xec   :  { %v177_v46 = vadd.f32 %v176_v42, %v89_v43  ;;  %v247_v47 = vpop.f32.mrf.mxu1 }
  0xed   :  { %v178_v45 = vpop.f32.mrf.mxu0  ;;  %v248_v1 = vadd.f32 %v247_v47, %v97_v62 }
  0xee   :  { %v179_v49 = vadd.f32 %v178_v45, %v93_v44  ;;  %v249_v53 = vpop.f32.mrf.mxu1 }
  0xef   :  { %v250_v61 = vadd.f32 %v249_v53, %v101_v58 }
 0x10d   :  { %v395_v48 = vpop.f32.mrf.mxu0  ;;  %v466_v56 = vpop.f32.mrf.mxu1 }
 0x10e   :  { %v471_v50 = vadd.f32 %v395_v48, %v177_v46  ;;  %v473_v4 = vadd.f32 %v466_v56, %v248_v1 }
 0x10f   :  { %v397_v52 = vpop.f32.mrf.mxu0  ;;  %v468_v60 = vpop.f32.mrf.mxu1 }
 0x110   :  { %v707_v54 = vmul.f32 -1.442695, %v471_v50  ;;  %v472_v55 = vadd.f32 %v397_v52, %v179_v49  ;;  %v474_v63 = vadd.f32 %v468_v60, %v250_v61 }
 0x112   :  { %825 = vpow2.f32 %v707_v54  ;;  %v708_v57 = vmul.f32 -1.442695, %v472_v55  ;;  %v709_v2 = vmul.f32 -1.442695, %v474_v63 }
 0x114   :  { %827 = vpow2.f32 %v708_v57 }
 0x115   :  { %829 = vpow2.f32 %v709_v2 }
 0x11f   :  { %v826_v3 = vpop.eup %825 }
 0x120   :  { %v478_v5 = vadd.f32 1.0, %v826_v3 }
 0x121   :  { %v828_v6 = vpop.eup %827 }
 0x122   :  { %831 = vrcp.f32 %v478_v5  ;;  %v484_v7 = vadd.f32 1.0, %v828_v6  ;;  %v830_v8 = vpop.eup %829 }
 0x123   :  { %833 = vtanh.f32 %v473_v4  ;;  %v491_v13 = vadd.f32 1.0, %v830_v8 }
 0x124   :  { %835 = vrcp.f32 %v484_v7 }
 0x125   :  { %837 = vrcp.f32 %v491_v13 }
 0x12f   :  { %v832_v9 = vpop.eup %831 }
 0x130   :  { %v834_v11 = vpop.eup %833 }
 0x131   :  { %v836_v12 = vpop.eup %835  ;;  %v495_v14 = vmul.f32 %v834_v11, %v832_v9 }
 0x132   :  { %v494_v15 = vmul.f32 %v836_v12, %v321_v10  ;;  %v838_v17 = vpop.eup %837 }
 0x134   :  { %v496_v16 = vadd.f32 %v495_v14, %v494_v15 }
 0x136   :  { %501 = vst [vmem:[%s1079_s12] sm:$0xff] %v496_v16  ;;  %839 = vtanh.f32 %v496_v16 }
 0x143   :  { %v840_v18 = vpop.eup %839 }
 0x144   :  { %v498_v19 = vmul.f32 %v840_v18, %v838_v17 }
 0x146   :  { %500 = vst [vmem:[%s1078_s11] sm:$0xff] %v498_v19  ;;  %779 = vmatmul.mubr.f32.vlgmr.msra.gmra.mxu0 %v498_v19 }
 0x206   :  { %v592_v24 = vpop.f32.mrf.mxu0 }
 0x207   :  { %v593_v25 = vadd.f32 %v710_v23, %v592_v24 }
 0x208   :  { %v780_v26 = vpop.f32.mrf.mxu0 }
 0x209   :  { %v596_v27 = vmax.f32 %v593_v25, 0.0 }
 0x20b   :  { %814 = vmatmul.mubr.f32.vlgmr.msra.gmra.mxu1 %v596_v27 }
 0x2cb   :  { %v686_v29 = vpop.f32.mrf.mxu1 }
 0x2cc   :  { %v687_v30 = vadd.f32 %v711_v28, %v686_v29 }
 0x2cd   :  { %v815_v31 = vpop.f32.mrf.mxu1 }
 0x2ce   :  { %690 = vst [vmem:[%s1077_s10] sm:$0xff] %v687_v30 }
 0x2cf   :  { %703 = vsyncpa [#allocation5], 1 }
 0x2d0   :  { %704 = vsyncpa [#allocation7], 1 }

</bundles_post_ra>
